<compile_context>
chip_gen: v7x
topology: tpu7x:2x2x1
jax: 0.10.0
libtpu: 0.0.40
codegen_flags: <defaults>
</compile_context>

<pallas_src>
import functools
import math

import jax
import jax.numpy as jnp
from jax.experimental import pallas as pl
from jax.experimental.pallas import tpu as pltpu

EPS = 1e-12


def _layernorm(z, gamma, beta):
    # BertLayerNorm: TF-style, epsilon inside the sqrt; rsqrt -> EUP.
    u = jnp.mean(z, axis=-1, keepdims=True)
    s = jnp.mean(jnp.square(z - u), axis=-1, keepdims=True)
    return gamma * ((z - u) * jax.lax.rsqrt(s + EPS)) + beta


def _attention_kernel(
    xq_ref, xkv_ref,
    wq_ref, bq_ref, wk_ref, bk_ref, wv_ref, bv_ref,
    w1_ref, b1_ref, g1_ref, be1_ref,
    w2_ref, b2_ref,
    w3_ref, b3_ref, g3_ref, be3_ref,
    o_ref,
    *, n_heads, head_dim,
):
    f32 = jnp.float32
    bf16 = jnp.bfloat16

    xq_f32 = xq_ref[...].astype(f32)            # (tq, H1) residual path in f32
    xq = xq_f32.astype(bf16)
    xkv = xkv_ref[...].astype(bf16)             # (S, H1)

    # QKV projections: bf16 MXU inputs, f32 accumulation, f32 bias add.
    q = jnp.dot(xq, wq_ref[...], preferred_element_type=f32) + bq_ref[...]
    k = jnp.dot(xkv, wk_ref[...], preferred_element_type=f32) + bk_ref[...]
    v = jnp.dot(xkv, wv_ref[...], preferred_element_type=f32) + bv_ref[...]

    # Fold 1/sqrt(head_dim) into q (mathematically identical to scaling scores).
    q = q * (1.0 / math.sqrt(head_dim))

    hd = head_dim
    # Head split: stack lane-slices into a leading head axis so both attention
    # contractions run as a single batched MXU stream (no per-head matmuls).
    qh = jnp.stack([q[:, h * hd:(h + 1) * hd] for h in range(n_heads)], axis=0).astype(bf16)
    kh = jnp.stack([k[:, h * hd:(h + 1) * hd] for h in range(n_heads)], axis=0).astype(bf16)
    vh = jnp.stack([v[:, h * hd:(h + 1) * hd] for h in range(n_heads)], axis=0).astype(bf16)

    # Scores for all heads at once; contraction over last dims (no explicit .T).
    s = jnp.einsum("hqd,hkd->hqk", qh, kh, preferred_element_type=f32)  # (nh, tq, S)
    m = jnp.max(s, axis=-1, keepdims=True)
    p = jnp.exp(s - m)
    denom = jnp.sum(p, axis=-1, keepdims=True)
    p = p * pl.reciprocal(denom, approx=True)   # softmax(dim=-1); drop_attn = identity

    ctx_h = jnp.einsum("hqk,hkd->hqd", p.astype(bf16), vh,
                       preferred_element_type=f32)                     # (nh, tq, hd)
    ctx = jnp.concatenate([ctx_h[h] for h in range(n_heads)], axis=-1)  # (tq, H1)

    # attn_out1 -> dropout(identity) -> residual -> LayerNorm
    a1_lin = jnp.dot(ctx.astype(bf16), w1_ref[...], preferred_element_type=f32) + b1_ref[...]
    a1 = _layernorm(a1_lin + xq_f32, g1_ref[...], be1_ref[...])

    # attn_out2 -> ReLU -> attn_out3 -> dropout(identity) -> residual -> LayerNorm
    h2 = jnp.maximum(
        jnp.dot(a1.astype(bf16), w2_ref[...], preferred_element_type=f32) + b2_ref[...], 0.0)
    a3_lin = jnp.dot(h2.astype(bf16), w3_ref[...], preferred_element_type=f32) + b3_ref[...]
    out = _layernorm(a3_lin + a1, g3_ref[...], be3_ref[...])

    o_ref[...] = out.astype(o_ref.dtype)


def _pick_q_tile(S, target=256):
    """Largest divisor of S that is a multiple of 8 and <= target, else S."""
    if S <= target:
        return S
    t = (target // 8) * 8
    while t >= 8:
        if S % t == 0:
            return t
        t -= 8
    return S


def attention_forward(x, params, *, n_heads):
    """x: (B, S, H1) float32.  params: dict of pre-transposed (in,out) weights."""
    B, S, H1 = x.shape
    H2 = params["w2"].shape[1]
    assert H1 % n_heads == 0
    head_dim = H1 // n_heads

    tq = _pick_q_tile(S)
    n_q_tiles = S // tq

    bf16, f32 = jnp.bfloat16, jnp.float32
    # Matmul weights in bf16 (half the VMEM residency, 2x MXU rate);
    # biases / LayerNorm params stay f32.
    weights = [
        params["wq"].astype(bf16), params["bq"].astype(f32),
        params["wk"].astype(bf16), params["bk"].astype(f32),
        params["wv"].astype(bf16), params["bv"].astype(f32),
        params["w1"].astype(bf16), params["b1"].astype(f32),
        params["g1"].astype(f32), params["be1"].astype(f32),
        params["w2"].astype(bf16), params["b2"].astype(f32),
        params["w3"].astype(bf16), params["b3"].astype(f32),
        params["g3"].astype(f32), params["be3"].astype(f32),
    ]

    def const_spec(shape):
        nd = len(shape)
        return pl.BlockSpec(shape, lambda b, qi, _nd=nd: (0,) * _nd)

    weight_specs = [const_spec(w.shape) for w in weights]
    x_q_spec = pl.BlockSpec((pl.Squeezed(), tq, H1), lambda b, qi: (b, qi, 0))
    x_kv_spec = pl.BlockSpec((pl.Squeezed(), S, H1), lambda b, qi: (b, 0, 0))
    out_spec = pl.BlockSpec((pl.Squeezed(), tq, H1), lambda b, qi: (b, qi, 0))

    kernel_body = functools.partial(_attention_kernel, n_heads=n_heads, head_dim=head_dim)

    if n_q_tiles == 1:
        # Query tile == full sequence: feed the same VMEM tile to both the
        # query/residual path and the K/V path (no duplicate HBM read of x).
        def kernel(x_ref, *rest):
            kernel_body(x_ref, x_ref, *rest)

        in_specs = [x_q_spec] + weight_specs
        args = (x, *weights)
        n_x_copies = 1
    else:
        kernel = kernel_body
        in_specs = [x_q_spec, x_kv_spec] + weight_specs
        args = (x, x, *weights)
        n_x_copies = 2

    # Explicit VMEM budget: resident weights + double-buffered activation tiles
    # + f32 intermediates, with generous slack.
    weight_bytes = sum(int(w.size) * w.dtype.itemsize for w in weights)
    io_bytes = (tq * H1 + (n_x_copies - 1) * S * H1 + tq * H1) * x.dtype.itemsize
    inter_bytes = 4 * (3 * S * H1 + 2 * n_heads * tq * S + 4 * tq * H1 + tq * H2)
    vmem_limit = int(min(64 * 1024 * 1024,
                         2 * weight_bytes + 2 * io_bytes + 2 * inter_bytes + (8 << 20)))

    return pl.pallas_call(
        kernel,
        out_shape=jax.ShapeDtypeStruct((B, S, H1), x.dtype),
        grid_spec=pltpu.PrefetchScalarGridSpec(
            num_scalar_prefetch=0,
            grid=(B, n_q_tiles),
            in_specs=in_specs,
            out_specs=out_spec,
        ),
        compiler_params=pltpu.CompilerParams(
            dimension_semantics=("parallel", "parallel"),
            vmem_limit_bytes=vmem_limit,
        ),
    )(*args)


def _reference_forward(x, params, *, n_heads):
    """Pure-JAX f32 reference mirroring the PyTorch forward (dropout = identity)."""
    B, S, H1 = x.shape
    hd = H1 // n_heads

    def lin(z, w, b):
        return z @ w + b

    q = lin(x, params["wq"], params["bq"])
    k = lin(x, params["wk"], params["bk"])
    v = lin(x, params["wv"], params["bv"])

    def split(z):  # (B,S,H1) -> (B,nh,S,hd)
        return z.reshape(B, S, n_heads, hd).transpose(0, 2, 1, 3)

    qh, kh, vh = split(q), split(k), split(v)
    scores = jnp.einsum("bhqd,bhkd->bhqk", qh, kh) / math.sqrt(hd)
    probs = jax.nn.softmax(scores, axis=-1)
    ctx = jnp.einsum("bhqk,bhkd->bhqd", probs, vh)
    ctx = ctx.transpose(0, 2, 1, 3).reshape(B, S, H1)

    def ln(z, g, b):
        u = jnp.mean(z, axis=-1, keepdims=True)
        s = jnp.mean((z - u) ** 2, axis=-1, keepdims=True)
        return g * ((z - u) / jnp.sqrt(s + EPS)) + b

    a1 = ln(lin(ctx, params["w1"], params["b1"]) + x, params["g1"], params["be1"])
    h2 = jax.nn.relu(lin(a1, params["w2"], params["b2"]))
    return ln(lin(h2, params["w3"], params["b3"]) + a1, params["g3"], params["be3"])


def _init_params(key, H1, H2):
    ks = jax.random.split(key, 10)

    def w(k, fan_in, fan_out):
        bound = 1.0 / math.sqrt(fan_in)
        return jax.random.uniform(k, (fan_in, fan_out), jnp.float32, -bound, bound)

    def b(k, fan_in, n):
        bound = 1.0 / math.sqrt(fan_in)
        return jax.random.uniform(k, (1, n), jnp.float32, -bound, bound)

    return {
        "wq": w(ks[0], H1, H1), "bq": b(ks[1], H1, H1),
        "wk": w(ks[2], H1, H1), "bk": b(ks[3], H1, H1),
        "wv": w(ks[4], H1, H1), "bv": b(ks[5], H1, H1),
        "w1": w(ks[6], H1, H1), "b1": b(ks[7], H1, H1),
        "g1": jnp.ones((1, H1), jnp.float32), "be1": jnp.zeros((1, H1), jnp.float32),
        "w2": w(ks[8], H1, H2), "b2": b(ks[8], H1, H2),
        "w3": w(ks[9], H2, H1), "b3": b(ks[9], H2, H1),
        "g3": jnp.ones((1, H1), jnp.float32), "be3": jnp.zeros((1, H1), jnp.float32),
    }


if __name__ == "__main__":
    B, S, H1, H2 = 2, 8, 32, 64
    n_heads = 4

    key = jax.random.PRNGKey(0)
    kx, kp = jax.random.split(key)
    x = jax.random.normal(kx, (B, S, H1), jnp.float32)
    params = _init_params(kp, H1, H2)

    out = attention_forward(x, params, n_heads=n_heads)
    out = jax.block_until_ready(out)

    ref = _reference_forward(x, params, n_heads=n_heads)
    assert out.shape == (B, S, H1)
    # bf16 MXU inputs + approx reciprocal -> loosened tolerance vs f32 reference.
    assert jnp.allclose(out, ref, rtol=3e-2, atol=3e-2), "mismatch vs JAX reference"

    print("KERNEL_OK")
</pallas_src>

<mosaic_0001>
module attributes {stable_mosaic.version = 11 : i64} {
  func.func @kernel(%arg0: i32, %arg1: i32, %arg2: memref<1x8x32xf32, #tpu.memory_space<vmem>>, %arg3: memref<32x32xbf16, #tpu.memory_space<vmem>>, %arg4: memref<1x32xf32, #tpu.memory_space<vmem>>, %arg5: memref<32x32xbf16, #tpu.memory_space<vmem>>, %arg6: memref<1x32xf32, #tpu.memory_space<vmem>>, %arg7: memref<32x32xbf16, #tpu.memory_space<vmem>>, %arg8: memref<1x32xf32, #tpu.memory_space<vmem>>, %arg9: memref<32x32xbf16, #tpu.memory_space<vmem>>, %arg10: memref<1x32xf32, #tpu.memory_space<vmem>>, %arg11: memref<1x32xf32, #tpu.memory_space<vmem>>, %arg12: memref<1x32xf32, #tpu.memory_space<vmem>>, %arg13: memref<32x64xbf16, #tpu.memory_space<vmem>>, %arg14: memref<1x64xf32, #tpu.memory_space<vmem>>, %arg15: memref<64x32xbf16, #tpu.memory_space<vmem>>, %arg16: memref<1x32xf32, #tpu.memory_space<vmem>>, %arg17: memref<1x32xf32, #tpu.memory_space<vmem>>, %arg18: memref<1x32xf32, #tpu.memory_space<vmem>>, %arg19: memref<1x8x32xf32, #tpu.memory_space<vmem>>) attributes {dimension_semantics = [#tpu.dimension_semantics<parallel>, #tpu.dimension_semantics<parallel>], iteration_bounds = array<i64: 2, 1>, scalar_prefetch = 0 : i64, scratch_operands = 0 : i64, tpu.core_type = #tpu.core_type<tc>, window_params = [{transform_indices = @transform_0, window_bounds = array<i64: 1, 8, 32>}, {pipeline_mode = #tpu.pipeline_mode<synchronous>, transform_indices = @transform_1, window_bounds = array<i64: 32, 32>}, {pipeline_mode = #tpu.pipeline_mode<synchronous>, transform_indices = @transform_2, window_bounds = array<i64: 1, 32>}, {pipeline_mode = #tpu.pipeline_mode<synchronous>, transform_indices = @transform_3, window_bounds = array<i64: 32, 32>}, {pipeline_mode = #tpu.pipeline_mode<synchronous>, transform_indices = @transform_4, window_bounds = array<i64: 1, 32>}, {pipeline_mode = #tpu.pipeline_mode<synchronous>, transform_indices = @transform_5, window_bounds = array<i64: 32, 32>}, {pipeline_mode = #tpu.pipeline_mode<synchronous>, transform_indices = @transform_6, window_bounds = array<i64: 1, 32>}, {pipeline_mode = #tpu.pipeline_mode<synchronous>, transform_indices = @transform_7, window_bounds = array<i64: 32, 32>}, {pipeline_mode = #tpu.pipeline_mode<synchronous>, transform_indices = @transform_8, window_bounds = array<i64: 1, 32>}, {pipeline_mode = #tpu.pipeline_mode<synchronous>, transform_indices = @transform_9, window_bounds = array<i64: 1, 32>}, {pipeline_mode = #tpu.pipeline_mode<synchronous>, transform_indices = @transform_10, window_bounds = array<i64: 1, 32>}, {pipeline_mode = #tpu.pipeline_mode<synchronous>, transform_indices = @transform_11, window_bounds = array<i64: 32, 64>}, {pipeline_mode = #tpu.pipeline_mode<synchronous>, transform_indices = @transform_12, window_bounds = array<i64: 1, 64>}, {pipeline_mode = #tpu.pipeline_mode<synchronous>, transform_indices = @transform_13, window_bounds = array<i64: 64, 32>}, {pipeline_mode = #tpu.pipeline_mode<synchronous>, transform_indices = @transform_14, window_bounds = array<i64: 1, 32>}, {pipeline_mode = #tpu.pipeline_mode<synchronous>, transform_indices = @transform_15, window_bounds = array<i64: 1, 32>}, {pipeline_mode = #tpu.pipeline_mode<synchronous>, transform_indices = @transform_16, window_bounds = array<i64: 1, 32>}, {transform_indices = @transform_17, window_bounds = array<i64: 1, 8, 32>}]} {
    %c0 = arith.constant 0 : index
    %c0_0 = arith.constant 0 : index
    %c0_1 = arith.constant 0 : index
    %0 = vector.load %arg2[%c0, %c0_0, %c0_1] : memref<1x8x32xf32, #tpu.memory_space<vmem>>, vector<1x8x32xf32>
    %1 = vector.shape_cast %0 : vector<1x8x32xf32> to vector<8x32xf32>
    %2 = arith.truncf %1 : vector<8x32xf32> to vector<8x32xbf16>
    %c0_2 = arith.constant 0 : index
    %c0_3 = arith.constant 0 : index
    %c0_4 = arith.constant 0 : index
    %3 = vector.load %arg2[%c0_2, %c0_3, %c0_4] : memref<1x8x32xf32, #tpu.memory_space<vmem>>, vector<1x8x32xf32>
    %4 = vector.shape_cast %3 : vector<1x8x32xf32> to vector<8x32xf32>
    %5 = arith.truncf %4 : vector<8x32xf32> to vector<8x32xbf16>
    %c0_5 = arith.constant 0 : index
    %c0_6 = arith.constant 0 : index
    %6 = vector.load %arg3[%c0_5, %c0_6] : memref<32x32xbf16, #tpu.memory_space<vmem>>, vector<32x32xbf16>
    %cst = arith.constant dense<0.000000e+00> : vector<8x32xf32>
    %7 = tpu.matmul %2, %6, %cst {dimension_numbers = #tpu.dot_dimension_numbers<[1], [0], [0], [1], [0, 0, 1, 1], [], []>} : vector<8x32xbf16>, vector<32x32xbf16>, vector<8x32xf32> -> vector<8x32xf32>
    %c0_7 = arith.constant 0 : index
    %c0_8 = arith.constant 0 : index
    %8 = vector.load %arg4[%c0_7, %c0_8] : memref<1x32xf32, #tpu.memory_space<vmem>>, vector<1x32xf32>
    %9 = vector.broadcast %8 : vector<1x32xf32> to vector<8x32xf32>
    %10 = arith.addf %7, %9 : vector<8x32xf32>
    %c0_9 = arith.constant 0 : index
    %c0_10 = arith.constant 0 : index
    %11 = vector.load %arg5[%c0_9, %c0_10] : memref<32x32xbf16, #tpu.memory_space<vmem>>, vector<32x32xbf16>
    %cst_11 = arith.constant dense<0.000000e+00> : vector<8x32xf32>
    %12 = tpu.matmul %5, %11, %cst_11 {dimension_numbers = #tpu.dot_dimension_numbers<[1], [0], [0], [1], [0, 0, 1, 1], [], []>} : vector<8x32xbf16>, vector<32x32xbf16>, vector<8x32xf32> -> vector<8x32xf32>
    %c0_12 = arith.constant 0 : index
    %c0_13 = arith.constant 0 : index
    %13 = vector.load %arg6[%c0_12, %c0_13] : memref<1x32xf32, #tpu.memory_space<vmem>>, vector<1x32xf32>
    %14 = vector.broadcast %13 : vector<1x32xf32> to vector<8x32xf32>
    %15 = arith.addf %12, %14 : vector<8x32xf32>
    %c0_14 = arith.constant 0 : index
    %c0_15 = arith.constant 0 : index
    %16 = vector.load %arg7[%c0_14, %c0_15] : memref<32x32xbf16, #tpu.memory_space<vmem>>, vector<32x32xbf16>
    %cst_16 = arith.constant dense<0.000000e+00> : vector<8x32xf32>
    %17 = tpu.matmul %5, %16, %cst_16 {dimension_numbers = #tpu.dot_dimension_numbers<[1], [0], [0], [1], [0, 0, 1, 1], [], []>} : vector<8x32xbf16>, vector<32x32xbf16>, vector<8x32xf32> -> vector<8x32xf32>
    %c0_17 = arith.constant 0 : index
    %c0_18 = arith.constant 0 : index
    %18 = vector.load %arg8[%c0_17, %c0_18] : memref<1x32xf32, #tpu.memory_space<vmem>>, vector<1x32xf32>
    %19 = vector.broadcast %18 : vector<1x32xf32> to vector<8x32xf32>
    %20 = arith.addf %17, %19 : vector<8x32xf32>
    %cst_19 = arith.constant 0.353553385 : f32
    %21 = vector.broadcast %cst_19 : f32 to vector<8x32xf32>
    %22 = arith.mulf %10, %21 : vector<8x32xf32>
    %23 = vector.extract_strided_slice %22 {offsets = [0, 0], sizes = [8, 8], strides = [1, 1]} : vector<8x32xf32> to vector<8x8xf32>
    %24 = vector.extract_strided_slice %22 {offsets = [0, 8], sizes = [8, 8], strides = [1, 1]} : vector<8x32xf32> to vector<8x8xf32>
    %25 = vector.extract_strided_slice %22 {offsets = [0, 16], sizes = [8, 8], strides = [1, 1]} : vector<8x32xf32> to vector<8x8xf32>
    %26 = vector.extract_strided_slice %22 {offsets = [0, 24], sizes = [8, 8], strides = [1, 1]} : vector<8x32xf32> to vector<8x8xf32>
    %27 = vector.shape_cast %23 : vector<8x8xf32> to vector<1x8x8xf32>
    %28 = vector.shape_cast %24 : vector<8x8xf32> to vector<1x8x8xf32>
    %29 = vector.shape_cast %25 : vector<8x8xf32> to vector<1x8x8xf32>
    %30 = vector.shape_cast %26 : vector<8x8xf32> to vector<1x8x8xf32>
    %31 = tpu.concatenate %27, %28, %29, %30 in 0 : vector<1x8x8xf32>, vector<1x8x8xf32>, vector<1x8x8xf32>, vector<1x8x8xf32> -> vector<4x8x8xf32>
    %32 = arith.truncf %31 : vector<4x8x8xf32> to vector<4x8x8xbf16>
    %33 = vector.extract_strided_slice %15 {offsets = [0, 0], sizes = [8, 8], strides = [1, 1]} : vector<8x32xf32> to vector<8x8xf32>
    %34 = vector.extract_strided_slice %15 {offsets = [0, 8], sizes = [8, 8], strides = [1, 1]} : vector<8x32xf32> to vector<8x8xf32>
    %35 = vector.extract_strided_slice %15 {offsets = [0, 16], sizes = [8, 8], strides = [1, 1]} : vector<8x32xf32> to vector<8x8xf32>
    %36 = vector.extract_strided_slice %15 {offsets = [0, 24], sizes = [8, 8], strides = [1, 1]} : vector<8x32xf32> to vector<8x8xf32>
    %37 = vector.shape_cast %33 : vector<8x8xf32> to vector<1x8x8xf32>
    %38 = vector.shape_cast %34 : vector<8x8xf32> to vector<1x8x8xf32>
    %39 = vector.shape_cast %35 : vector<8x8xf32> to vector<1x8x8xf32>
    %40 = vector.shape_cast %36 : vector<8x8xf32> to vector<1x8x8xf32>
    %41 = tpu.concatenate %37, %38, %39, %40 in 0 : vector<1x8x8xf32>, vector<1x8x8xf32>, vector<1x8x8xf32>, vector<1x8x8xf32> -> vector<4x8x8xf32>
    %42 = arith.truncf %41 : vector<4x8x8xf32> to vector<4x8x8xbf16>
    %43 = vector.extract_strided_slice %20 {offsets = [0, 0], sizes = [8, 8], strides = [1, 1]} : vector<8x32xf32> to vector<8x8xf32>
    %44 = vector.extract_strided_slice %20 {offsets = [0, 8], sizes = [8, 8], strides = [1, 1]} : vector<8x32xf32> to vector<8x8xf32>
    %45 = vector.extract_strided_slice %20 {offsets = [0, 16], sizes = [8, 8], strides = [1, 1]} : vector<8x32xf32> to vector<8x8xf32>
    %46 = vector.extract_strided_slice %20 {offsets = [0, 24], sizes = [8, 8], strides = [1, 1]} : vector<8x32xf32> to vector<8x8xf32>
    %47 = vector.shape_cast %43 : vector<8x8xf32> to vector<1x8x8xf32>
    %48 = vector.shape_cast %44 : vector<8x8xf32> to vector<1x8x8xf32>
    %49 = vector.shape_cast %45 : vector<8x8xf32> to vector<1x8x8xf32>
    %50 = vector.shape_cast %46 : vector<8x8xf32> to vector<1x8x8xf32>
    %51 = tpu.concatenate %47, %48, %49, %50 in 0 : vector<1x8x8xf32>, vector<1x8x8xf32>, vector<1x8x8xf32>, vector<1x8x8xf32> -> vector<4x8x8xf32>
    %52 = arith.truncf %51 : vector<4x8x8xf32> to vector<4x8x8xbf16>
    "tpu.trace_start"() <{level = 10 : i32, message = "hqd,hkd->hqk"}> : () -> ()
    %cst_20 = arith.constant dense<0.000000e+00> : vector<4x8x8xf32>
    %53 = tpu.matmul %32, %42, %cst_20 {dimension_numbers = #tpu.dot_dimension_numbers<[2], [2], [1], [1], [0, 0, 0, 1, 1, 1], [0], [0]>} : vector<4x8x8xbf16>, vector<4x8x8xbf16>, vector<4x8x8xf32> -> vector<4x8x8xf32>
    "tpu.trace_stop"() : () -> ()
    %cst_21 = arith.constant dense<0xFF800000> : vector<4x8xf32>
    %54 = vector.multi_reduction <maximumf>, %53, %cst_21 [2] : vector<4x8x8xf32> to vector<4x8xf32>
    %55 = vector.shape_cast %54 : vector<4x8xf32> to vector<4x8x1xf32>
    %56 = vector.broadcast %55 : vector<4x8x1xf32> to vector<4x8x8xf32>
    %57 = arith.subf %53, %56 : vector<4x8x8xf32>
    %58 = math.exp %57 : vector<4x8x8xf32>
    %cst_22 = arith.constant dense<0.000000e+00> : vector<4x8xf32>
    %59 = vector.multi_reduction <add>, %58, %cst_22 [2] : vector<4x8x8xf32> to vector<4x8xf32>
    %60 = vector.shape_cast %59 : vector<4x8xf32> to vector<4x8x1xf32>
    %61 = tpu.reciprocal %60 {approx = true} : vector<4x8x1xf32> -> vector<4x8x1xf32>
    %62 = vector.broadcast %61 : vector<4x8x1xf32> to vector<4x8x8xf32>
    %63 = arith.mulf %58, %62 : vector<4x8x8xf32>
    %64 = arith.truncf %63 : vector<4x8x8xf32> to vector<4x8x8xbf16>
    "tpu.trace_start"() <{level = 10 : i32, message = "hqk,hkd->hqd"}> : () -> ()
    %cst_23 = arith.constant dense<0.000000e+00> : vector<4x8x8xf32>
    %65 = tpu.matmul %64, %52, %cst_23 {dimension_numbers = #tpu.dot_dimension_numbers<[2], [1], [1], [2], [0, 0, 0, 1, 1, 2], [0], [0]>} : vector<4x8x8xbf16>, vector<4x8x8xbf16>, vector<4x8x8xf32> -> vector<4x8x8xf32>
    "tpu.trace_stop"() : () -> ()
    %66 = vector.extract_strided_slice %65 {offsets = [0, 0, 0], sizes = [1, 8, 8], strides = [1, 1, 1]} : vector<4x8x8xf32> to vector<1x8x8xf32>
    %67 = vector.shape_cast %66 : vector<1x8x8xf32> to vector<8x8xf32>
    %68 = vector.extract_strided_slice %65 {offsets = [1, 0, 0], sizes = [1, 8, 8], strides = [1, 1, 1]} : vector<4x8x8xf32> to vector<1x8x8xf32>
    %69 = vector.shape_cast %68 : vector<1x8x8xf32> to vector<8x8xf32>
    %70 = vector.extract_strided_slice %65 {offsets = [2, 0, 0], sizes = [1, 8, 8], strides = [1, 1, 1]} : vector<4x8x8xf32> to vector<1x8x8xf32>
    %71 = vector.shape_cast %70 : vector<1x8x8xf32> to vector<8x8xf32>
    %72 = vector.extract_strided_slice %65 {offsets = [3, 0, 0], sizes = [1, 8, 8], strides = [1, 1, 1]} : vector<4x8x8xf32> to vector<1x8x8xf32>
    %73 = vector.shape_cast %72 : vector<1x8x8xf32> to vector<8x8xf32>
    %74 = tpu.concatenate %67, %69, %71, %73 in 1 : vector<8x8xf32>, vector<8x8xf32>, vector<8x8xf32>, vector<8x8xf32> -> vector<8x32xf32>
    %75 = arith.truncf %74 : vector<8x32xf32> to vector<8x32xbf16>
    %c0_24 = arith.constant 0 : index
    %c0_25 = arith.constant 0 : index
    %76 = vector.load %arg9[%c0_24, %c0_25] : memref<32x32xbf16, #tpu.memory_space<vmem>>, vector<32x32xbf16>
    %cst_26 = arith.constant dense<0.000000e+00> : vector<8x32xf32>
    %77 = tpu.matmul %75, %76, %cst_26 {dimension_numbers = #tpu.dot_dimension_numbers<[1], [0], [0], [1], [0, 0, 1, 1], [], []>} : vector<8x32xbf16>, vector<32x32xbf16>, vector<8x32xf32> -> vector<8x32xf32>
    %c0_27 = arith.constant 0 : index
    %c0_28 = arith.constant 0 : index
    %78 = vector.load %arg10[%c0_27, %c0_28] : memref<1x32xf32, #tpu.memory_space<vmem>>, vector<1x32xf32>
    %79 = vector.broadcast %78 : vector<1x32xf32> to vector<8x32xf32>
    %80 = arith.addf %77, %79 : vector<8x32xf32>
    %81 = arith.addf %80, %1 : vector<8x32xf32>
    %c0_29 = arith.constant 0 : index
    %c0_30 = arith.constant 0 : index
    %82 = vector.load %arg11[%c0_29, %c0_30] : memref<1x32xf32, #tpu.memory_space<vmem>>, vector<1x32xf32>
    %c0_31 = arith.constant 0 : index
    %c0_32 = arith.constant 0 : index
    %83 = vector.load %arg12[%c0_31, %c0_32] : memref<1x32xf32, #tpu.memory_space<vmem>>, vector<1x32xf32>
    %cst_33 = arith.constant dense<0.000000e+00> : vector<8xf32>
    %84 = vector.multi_reduction <add>, %81, %cst_33 [1] : vector<8x32xf32> to vector<8xf32>
    %85 = vector.shape_cast %84 : vector<8xf32> to vector<8x1xf32>
    %cst_34 = arith.constant 3.200000e+01 : f32
    %86 = vector.broadcast %cst_34 : f32 to vector<8x1xf32>
    %87 = arith.divf %85, %86 : vector<8x1xf32>
    %88 = vector.broadcast %87 : vector<8x1xf32> to vector<8x32xf32>
    %89 = arith.subf %81, %88 : vector<8x32xf32>
    %90 = arith.mulf %89, %89 : vector<8x32xf32>
    %cst_35 = arith.constant dense<0.000000e+00> : vector<8xf32>
    %91 = vector.multi_reduction <add>, %90, %cst_35 [1] : vector<8x32xf32> to vector<8xf32>
    %92 = vector.shape_cast %91 : vector<8xf32> to vector<8x1xf32>
    %cst_36 = arith.constant 3.200000e+01 : f32
    %93 = vector.broadcast %cst_36 : f32 to vector<8x1xf32>
    %94 = arith.divf %92, %93 : vector<8x1xf32>
    %95 = vector.broadcast %87 : vector<8x1xf32> to vector<8x32xf32>
    %96 = arith.subf %81, %95 : vector<8x32xf32>
    %cst_37 = arith.constant 9.99999996E-13 : f32
    %97 = vector.broadcast %cst_37 : f32 to vector<8x1xf32>
    %98 = arith.addf %94, %97 : vector<8x1xf32>
    %99 = math.rsqrt %98 : vector<8x1xf32>
    %100 = vector.broadcast %99 : vector<8x1xf32> to vector<8x32xf32>
    %101 = arith.mulf %96, %100 : vector<8x32xf32>
    %102 = vector.broadcast %82 : vector<1x32xf32> to vector<8x32xf32>
    %103 = arith.mulf %102, %101 : vector<8x32xf32>
    %104 = vector.broadcast %83 : vector<1x32xf32> to vector<8x32xf32>
    %105 = arith.addf %103, %104 : vector<8x32xf32>
    %106 = arith.truncf %105 : vector<8x32xf32> to vector<8x32xbf16>
    %c0_38 = arith.constant 0 : index
    %c0_39 = arith.constant 0 : index
    %107 = vector.load %arg13[%c0_38, %c0_39] : memref<32x64xbf16, #tpu.memory_space<vmem>>, vector<32x64xbf16>
    %cst_40 = arith.constant dense<0.000000e+00> : vector<8x64xf32>
    %108 = tpu.matmul %106, %107, %cst_40 {dimension_numbers = #tpu.dot_dimension_numbers<[1], [0], [0], [1], [0, 0, 1, 1], [], []>} : vector<8x32xbf16>, vector<32x64xbf16>, vector<8x64xf32> -> vector<8x64xf32>
    %c0_41 = arith.constant 0 : index
    %c0_42 = arith.constant 0 : index
    %109 = vector.load %arg14[%c0_41, %c0_42] : memref<1x64xf32, #tpu.memory_space<vmem>>, vector<1x64xf32>
    %110 = vector.broadcast %109 : vector<1x64xf32> to vector<8x64xf32>
    %111 = arith.addf %108, %110 : vector<8x64xf32>
    %cst_43 = arith.constant 0.000000e+00 : f32
    %112 = vector.broadcast %cst_43 : f32 to vector<8x64xf32>
    %113 = arith.maximumf %111, %112 : vector<8x64xf32>
    %114 = arith.truncf %113 : vector<8x64xf32> to vector<8x64xbf16>
    %c0_44 = arith.constant 0 : index
    %c0_45 = arith.constant 0 : index
    %115 = vector.load %arg15[%c0_44, %c0_45] : memref<64x32xbf16, #tpu.memory_space<vmem>>, vector<64x32xbf16>
    %cst_46 = arith.constant dense<0.000000e+00> : vector<8x32xf32>
    %116 = tpu.matmul %114, %115, %cst_46 {dimension_numbers = #tpu.dot_dimension_numbers<[1], [0], [0], [1], [0, 0, 1, 1], [], []>} : vector<8x64xbf16>, vector<64x32xbf16>, vector<8x32xf32> -> vector<8x32xf32>
    %c0_47 = arith.constant 0 : index
    %c0_48 = arith.constant 0 : index
    %117 = vector.load %arg16[%c0_47, %c0_48] : memref<1x32xf32, #tpu.memory_space<vmem>>, vector<1x32xf32>
    %118 = vector.broadcast %117 : vector<1x32xf32> to vector<8x32xf32>
    %119 = arith.addf %116, %118 : vector<8x32xf32>
    %120 = arith.addf %119, %105 : vector<8x32xf32>
    %c0_49 = arith.constant 0 : index
    %c0_50 = arith.constant 0 : index
    %121 = vector.load %arg17[%c0_49, %c0_50] : memref<1x32xf32, #tpu.memory_space<vmem>>, vector<1x32xf32>
    %c0_51 = arith.constant 0 : index
    %c0_52 = arith.constant 0 : index
    %122 = vector.load %arg18[%c0_51, %c0_52] : memref<1x32xf32, #tpu.memory_space<vmem>>, vector<1x32xf32>
    %cst_53 = arith.constant dense<0.000000e+00> : vector<8xf32>
    %123 = vector.multi_reduction <add>, %120, %cst_53 [1] : vector<8x32xf32> to vector<8xf32>
    %124 = vector.shape_cast %123 : vector<8xf32> to vector<8x1xf32>
    %cst_54 = arith.constant 3.200000e+01 : f32
    %125 = vector.broadcast %cst_54 : f32 to vector<8x1xf32>
    %126 = arith.divf %124, %125 : vector<8x1xf32>
    %127 = vector.broadcast %126 : vector<8x1xf32> to vector<8x32xf32>
    %128 = arith.subf %120, %127 : vector<8x32xf32>
    %129 = arith.mulf %128, %128 : vector<8x32xf32>
    %cst_55 = arith.constant dense<0.000000e+00> : vector<8xf32>
    %130 = vector.multi_reduction <add>, %129, %cst_55 [1] : vector<8x32xf32> to vector<8xf32>
    %131 = vector.shape_cast %130 : vector<8xf32> to vector<8x1xf32>
    %cst_56 = arith.constant 3.200000e+01 : f32
    %132 = vector.broadcast %cst_56 : f32 to vector<8x1xf32>
    %133 = arith.divf %131, %132 : vector<8x1xf32>
    %134 = vector.broadcast %126 : vector<8x1xf32> to vector<8x32xf32>
    %135 = arith.subf %120, %134 : vector<8x32xf32>
    %cst_57 = arith.constant 9.99999996E-13 : f32
    %136 = vector.broadcast %cst_57 : f32 to vector<8x1xf32>
    %137 = arith.addf %133, %136 : vector<8x1xf32>
    %138 = math.rsqrt %137 : vector<8x1xf32>
    %139 = vector.broadcast %138 : vector<8x1xf32> to vector<8x32xf32>
    %140 = arith.mulf %135, %139 : vector<8x32xf32>
    %141 = vector.broadcast %121 : vector<1x32xf32> to vector<8x32xf32>
    %142 = arith.mulf %141, %140 : vector<8x32xf32>
    %143 = vector.broadcast %122 : vector<1x32xf32> to vector<8x32xf32>
    %144 = arith.addf %142, %143 : vector<8x32xf32>
    %c0_58 = arith.constant 0 : index
    %c0_59 = arith.constant 0 : index
    %c0_60 = arith.constant 0 : index
    %145 = vector.load %arg19[%c0_58, %c0_59, %c0_60] : memref<1x8x32xf32, #tpu.memory_space<vmem>>, vector<1x8x32xf32>
    %146 = vector.shape_cast %145 : vector<1x8x32xf32> to vector<8x32xf32>
    %147 = vector.shape_cast %144 : vector<8x32xf32> to vector<1x8x32xf32>
    tpu.vector_store %arg19[%c0_58, %c0_59, %c0_60], %147 {strides = array<i32>} : memref<1x8x32xf32, #tpu.memory_space<vmem>>, vector<1x8x32xf32>,
    return
  }
  func.func @transform_0(%arg0: i32, %arg1: i32) -> (i32, i32, i32) {
    %c0_i32 = arith.constant 0 : i32
    %c0_i32_0 = arith.constant 0 : i32
    return %arg0, %arg1, %c0_i32 : i32, i32, i32
  }
  func.func @transform_1(%arg0: i32, %arg1: i32) -> (i32, i32) {
    %c0_i32 = arith.constant 0 : i32
    %c0_i32_0 = arith.constant 0 : i32
    %c0_i32_1 = arith.constant 0 : i32
    return %c0_i32, %c0_i32_0 : i32, i32
  }
  func.func @transform_2(%arg0: i32, %arg1: i32) -> (i32, i32) {
    %c0_i32 = arith.constant 0 : i32
    %c0_i32_0 = arith.constant 0 : i32
    %c0_i32_1 = arith.constant 0 : i32
    return %c0_i32, %c0_i32_0 : i32, i32
  }
  func.func @transform_3(%arg0: i32, %arg1: i32) -> (i32, i32) {
    %c0_i32 = arith.constant 0 : i32
    %c0_i32_0 = arith.constant 0 : i32
    %c0_i32_1 = arith.constant 0 : i32
    return %c0_i32, %c0_i32_0 : i32, i32
  }
  func.func @transform_4(%arg0: i32, %arg1: i32) -> (i32, i32) {
    %c0_i32 = arith.constant 0 : i32
    %c0_i32_0 = arith.constant 0 : i32
    %c0_i32_1 = arith.constant 0 : i32
    return %c0_i32, %c0_i32_0 : i32, i32
  }
  func.func @transform_5(%arg0: i32, %arg1: i32) -> (i32, i32) {
    %c0_i32 = arith.constant 0 : i32
    %c0_i32_0 = arith.constant 0 : i32
    %c0_i32_1 = arith.constant 0 : i32
    return %c0_i32, %c0_i32_0 : i32, i32
  }
  func.func @transform_6(%arg0: i32, %arg1: i32) -> (i32, i32) {
    %c0_i32 = arith.constant 0 : i32
    %c0_i32_0 = arith.constant 0 : i32
    %c0_i32_1 = arith.constant 0 : i32
    return %c0_i32, %c0_i32_0 : i32, i32
  }
  func.func @transform_7(%arg0: i32, %arg1: i32) -> (i32, i32) {
    %c0_i32 = arith.constant 0 : i32
    %c0_i32_0 = arith.constant 0 : i32
    %c0_i32_1 = arith.constant 0 : i32
    return %c0_i32, %c0_i32_0 : i32, i32
  }
  func.func @transform_8(%arg0: i32, %arg1: i32) -> (i32, i32) {
    %c0_i32 = arith.constant 0 : i32
    %c0_i32_0 = arith.constant 0 : i32
    %c0_i32_1 = arith.constant 0 : i32
    return %c0_i32, %c0_i32_0 : i32, i32
  }
  func.func @transform_9(%arg0: i32, %arg1: i32) -> (i32, i32) {
    %c0_i32 = arith.constant 0 : i32
    %c0_i32_0 = arith.constant 0 : i32
    %c0_i32_1 = arith.constant 0 : i32
    return %c0_i32, %c0_i32_0 : i32, i32
  }
  func.func @transform_10(%arg0: i32, %arg1: i32) -> (i32, i32) {
    %c0_i32 = arith.constant 0 : i32
    %c0_i32_0 = arith.constant 0 : i32
    %c0_i32_1 = arith.constant 0 : i32
    return %c0_i32, %c0_i32_0 : i32, i32
  }
  func.func @transform_11(%arg0: i32, %arg1: i32) -> (i32, i32) {
    %c0_i32 = arith.constant 0 : i32
    %c0_i32_0 = arith.constant 0 : i32
    %c0_i32_1 = arith.constant 0 : i32
    return %c0_i32, %c0_i32_0 : i32, i32
  }
  func.func @transform_12(%arg0: i32, %arg1: i32) -> (i32, i32) {
    %c0_i32 = arith.constant 0 : i32
    %c0_i32_0 = arith.constant 0 : i32
    %c0_i32_1 = arith.constant 0 : i32
    return %c0_i32, %c0_i32_0 : i32, i32
  }
  func.func @transform_13(%arg0: i32, %arg1: i32) -> (i32, i32) {
    %c0_i32 = arith.constant 0 : i32
    %c0_i32_0 = arith.constant 0 : i32
    %c0_i32_1 = arith.constant 0 : i32
    return %c0_i32, %c0_i32_0 : i32, i32
  }
  func.func @transform_14(%arg0: i32, %arg1: i32) -> (i32, i32) {
    %c0_i32 = arith.constant 0 : i32
    %c0_i32_0 = arith.constant 0 : i32
    %c0_i32_1 = arith.constant 0 : i32
    return %c0_i32, %c0_i32_0 : i32, i32
  }
  func.func @transform_15(%arg0: i32, %arg1: i32) -> (i32, i32) {
    %c0_i32 = arith.constant 0 : i32
    %c0_i32_0 = arith.constant 0 : i32
    %c0_i32_1 = arith.constant 0 : i32
    return %c0_i32, %c0_i32_0 : i32, i32
  }
  func.func @transform_16(%arg0: i32, %arg1: i32) -> (i32, i32) {
    %c0_i32 = arith.constant 0 : i32
    %c0_i32_0 = arith.constant 0 : i32
    %c0_i32_1 = arith.constant 0 : i32
    return %c0_i32, %c0_i32_0 : i32, i32
  }
  func.func @transform_17(%arg0: i32, %arg1: i32) -> (i32, i32, i32) {
    %c0_i32 = arith.constant 0 : i32
    %c0_i32_0 = arith.constant 0 : i32
    return %arg0, %arg1, %c0_i32 : i32, i32, i32
  }
}

</mosaic_0001>

<bundles_post_ra>
// kernel: tpu_custom_call.1
= control target key start
LH: loop header
LB: loop body
LE: loop exit
PB: predicated region body
PF: predicated region fallthrough
CT: control target
= control target key end

     0   :  { %s2821_s0 = inlined_call_operand.vmem [shape: f32[2,8,32], index: 0, kind: input, shape index: {}]   ;;  %s2822_s1 = inlined_call_operand.vmem [shape: bf16[32,32], index: 1, kind: input, shape index: {}]   ;;  %s2823_s2 = inlined_call_operand.vmem [shape: f32[1,32], index: 2, kind: input, shape index: {}]   ;;  %s2824_s3 = inlined_call_operand.vmem [shape: bf16[32,32], index: 3, kind: input, shape index: {}]   ;;  %s2825_s4 = inlined_call_operand.vmem [shape: f32[1,32], index: 4, kind: input, shape index: {}]   ;;  %s2826_s5 = inlined_call_operand.hbm [shape: bf16[32,32], index: 5, kind: input, shape index: {}]   ;;  %s2827_s6 = inlined_call_operand.hbm [shape: f32[1,32], index: 6, kind: input, shape index: {}]   ;;  %s2828_s7 = inlined_call_operand.hbm [shape: bf16[32,32], index: 7, kind: input, shape index: {}]   ;;  %s2829_s8 = inlined_call_operand.hbm [shape: f32[1,32], index: 8, kind: input, shape index: {}]   ;;  %s2830_s9 = inlined_call_operand.hbm [shape: f32[1,32], index: 9, kind: input, shape index: {}]   ;;  %s2831_s10 = inlined_call_operand.vmem [shape: f32[1,32], index: 10, kind: input, shape index: {}]   ;;  %s2832_s11 = inlined_call_operand.vmem [shape: bf16[32,64], index: 11, kind: input, shape index: {}]   ;;  %s2833_s12 = inlined_call_operand.vmem [shape: f32[1,64], index: 12, kind: input, shape index: {}]   ;;  %s2834_s13 = inlined_call_operand.vmem [shape: bf16[64,32], index: 13, kind: input, shape index: {}]   ;;  %s2835_s14 = inlined_call_operand.vmem [shape: f32[1,32], index: 14, kind: input, shape index: {}]   ;;  %s2836_s15 = inlined_call_operand.vmem [shape: f32[1,32], index: 15, kind: input, shape index: {}]   ;;  %s2837_s16 = inlined_call_operand.vmem [shape: f32[1,32], index: 16, kind: input, shape index: {}]   ;;  %s2838_s17 = inlined_call_operand.hbm [shape: f32[2,8,32], index: 17, kind: output, shape index: {}]  }
   0x1   :  { %2854 = sst [smem:[#allocation24_spill]] %s2821_s0 }
   0x2   :  { %2855 = sst [smem:[#allocation25_spill]] %s2822_s1 }
   0x3   :  { %2856 = sst [smem:[#allocation26_spill]] %s2827_s6 }
   0x4   :  { %2857 = sst [smem:[#allocation27_spill]] %s2829_s8 }
   0x5   :  { %2858 = sst [smem:[#allocation28_spill]] %s2836_s15 }
   0x6   :  { %2859 = sst [smem:[#allocation29_spill]] %s2837_s16 }
   0x7   :  { %2860 = sst [smem:[#allocation30_spill]] %s2838_s17 }
   0x8   :  { %22 = vsyncpa [#allocation3], 0 }
   0x9   :  { %23 = vsyncpa [#allocation6], 0 }
   0xa   :  { %24 = vsyncpa [#allocation9], 0 }
   0xb   :  { %25 = vsyncpa [#allocation4], 0 }
   0xc   :  { %27 = vsyncpa [#allocation4 + $0x1], 0  ;;  %s2410_s24 = smov 0   ;;  %s2412_s25 = smov 0  }
   0xd   :  { %s2414_s26 = smov 0   ;;  %s2416_s27 = smov 0  }
   0xe   :  { %s2418_s28 = smov 0   ;;  %s2420_s29 = smov 0  }
   0xf LB: > { %2861 = sst [smem:[#allocation16_spill]] %s2282_s24  ;;  %s1727_s0 = sadd.s32 4294967295, %s2302_s29   ;;  %s2302_s29 = sphi %s2420_s29, %s33_s29   ;;  %s2298_s28 = sphi %s2418_s28, %s2898_s28   ;;  %s2294_s27 = sphi %s2416_s27, %s2894_s27   ;;  %s2290_s26 = sphi %s2414_s26, %s2893_s26   ;;  %s2286_s25 = sphi %s2412_s25, %s2897_s25   ;;  %s2282_s24 = sphi %s2410_s24, %s2896_s24  }
  0x10   : > { %2862 = sst [smem:[#allocation17_spill]] %s2290_s26  ;;  %s1728_s30 = sadd.s32 4294967294, %s2302_s29  }
  0x11   : > { %2863 = sst [smem:[#allocation18_spill]] %s2298_s28  ;;  %s45_s18 = sadd.s32 1, %s2298_s28 }
  0x12   : > { %2864 = sst [smem:[#allocation19_spill]] %s2302_s29  ;;  %s418_s19 = sadd.s32 1, %s2290_s26 }
  0x13   : > { %p47_p0 = scmp.ge.s32.totalorder %s45_s18, 2  ;;  %p428_p1 = scmp.ne.s32.totalorder %s2290_s26, %s2286_s25 }
  0x14   : > { %p429_p2 = scmp.eq.s32.totalorder %s1727_s0, 1  ;;  %p434_p3 = scmp.ne.s32.totalorder %s2286_s25, %s2282_s24 }
  0x15   : > { %s2900_s18 = smov (%p47_p0, %s45_s18), 0  ;;  %p435_p5 = scmp.eq.s32.totalorder %s1728_s30, 1 }
  0x16   : > { %2865 = sst [smem:[#allocation20_spill]] %s2900_s18  ;;  %p2450_p4 = por %p429_p2, %p428_p1 }
  0x17   : > { %s413_s20 = ssub.s32 %s2298_s28, %s2900_s18  ;;  %p1729_p6 = scmp.ge.s32.totalorder %s2302_s29, 1 }
  0x18   : > { %s2866_s1 = scalar_select %p2450_p4, 1, 0 }
  0x19   : > { %p416_p7 = scmp.eq.s32.totalorder %s413_s20, 0  ;;  %p2457_p8 = por %p435_p5, %p434_p3 }
  0x1a   : > { %2867 = sst [smem:[#allocation21_spill]] %s2866_s1  ;;  %p442_p9 = scmp.lt.s32.totalorder %s2302_s29, 3 }
  0x1b   : > { %s2868_s21 = scalar_select %p2457_p8, 1, 0 }
  0x1c   : > { %s2463_s22 = scalar_select %p416_p7, %s2290_s26, %s418_s19  }
  0x1d   : > { %2869 = sst [smem:[#allocation22_spill]] %s2868_s21  ;;  %p2465_p10 = pnand %p1729_p6, %p442_p9 }
  0x1e   : > { %2870 = sst [smem:[#allocation23_spill]] %s2463_s22  ;;  %p2469_p11 = scmp.eq.s32.totalorder %s1727_s0, 0 }
  0x1f   : > { %s2871_s23 = scalar_select %p2465_p10, 1, 0 }
  0x20   : > { %s2872_s24 = scalar_select %p2469_p11, 1, 0 }
  0x21   : > { %p1944_p12 = pneg %p2465_p10  ;;  %s2304_s30 = smov [#allocation5]  }
  0x22   : > { %s480_s20 = sshll.u32 %s2304_s30, 4  ;;  %s2305_s18 = smov [#allocation8]   ;;  %s481_s20 = int_to_ptr.vmem [resolvable:$true] %s480_s20 }
  0x23   : > { %s504_s28 = sshll.u32 %s2305_s18, 4  ;;  %p2477_p13 = pnand %p2469_p11, %p1944_p12  ;;  %s2481_s28 = int_to_ptr.vmem [resolvable:$true] %s504_s28 }
  0x24   : > { %s2874_s6 = sld [smem:[#allocation26_spill]] }
  0x25   : > { %p2491_p1 = pneg %p2477_p13 }
  0x2a   : > { %s2072_s26 = scalar_lea.hbm %s2874_s6, 16 }
  0x2b   : > { %p2073_p0 = scmp.ne.s32.totalorder %s2874_s6, %s2072_s26  ;;  %p2079_p5 = scmp.lt.u32.totalorder %s2072_s26, %s2874_s6 }
  0x2d   : > { %p2075_p2 = pnand %p2491_p1, %p2073_p0 }
  0x2f   : > { %p2076_p3 = pneg %p2075_p2 }
  0x31   : > { %p2081_p6 = pnand %p2079_p5, %p2076_p3 }
  0x33   : > { %2084 = shalt.err (!%p2081_p6)
}
  0x34   : > { %s2085_s22 = scalar_lea.vmem %s481_s20, 16  ;;  %s2092_s29 = scalar_lea.vmem %s481_s20, 32 }
  0x35   : > { %p2086_p7 = scmp.ne.s32.totalorder %s481_s20, %s2085_s22  ;;  %p2093_p8 = scmp.lt.s32.totalorder %s481_s20, %s481_s20 }
  0x36   : > { %p2094_p4 = scmp.lt.s32.totalorder %s2092_s29, %s2085_s22 }
  0x37   : > { %p2088_p9 = pnand %p2086_p7, %p2491_p1 }
  0x38   : > { %p2095_p11 = por %p2094_p4, %p2093_p8 }
  0x39   : > { %p2089_p12 = pneg %p2088_p9 }
  0x3b   : > { %p2096_p10 = pnand %p2095_p11, %p2089_p12 }
  0x3d   : > { %2099 = shalt.err (!%p2096_p10)
}
  0x3e   : > { %1950 = dma.hbm_to_vmem [thread:$0]  (!%p2477_p13), %s2874_s6, 16, %s481_s20, [#allocation6]  }
  0x3f   : > { %s2876_s8 = sld [smem:[#allocation27_spill]] }
  0x45   : > { %s2100_s18 = scalar_lea.hbm %s2876_s8, 16 }
  0x46   : > { %p2101_p0 = scmp.ne.s32.totalorder %s2876_s8, %s2100_s18  ;;  %p2107_p8 = scmp.lt.u32.totalorder %s2100_s18, %s2876_s8 }
  0x48   : > { %p2103_p2 = pnand %p2101_p0, %p2491_p1 }
  0x4a   : > { %p2104_p4 = pneg %p2103_p2 }
  0x4c   : > { %p2109_p10 = pnand %p2107_p8, %p2104_p4 }
  0x4e   : > { %2112 = shalt.err (!%p2109_p10)
}
  0x4f   : > { %s2113_s20 = scalar_lea.vmem %s2481_s28, 16  ;;  %s2120_s15 = scalar_lea.vmem %s2481_s28, 32 }
  0x50   : > { %p2114_p11 = scmp.ne.s32.totalorder %s2481_s28, %s2113_s20  ;;  %p2121_p6 = scmp.lt.s32.totalorder %s2481_s28, %s2481_s28 }
  0x51   : > { %p2122_p7 = scmp.lt.s32.totalorder %s2120_s15, %s2113_s20 }
  0x52   : > { %p2116_p3 = pnand %p2114_p11, %p2491_p1 }
  0x53   : > { %p2123_p9 = por %p2122_p7, %p2121_p6 }
  0x54   : > { %p2117_p5 = pneg %p2116_p3 }
  0x56   : > { %p2124_p12 = pnand %p2123_p9, %p2117_p5 }
  0x58   : > { %2127 = shalt.err (!%p2124_p12)
}
  0x59   : > { %1956 = dma.hbm_to_vmem [thread:$0]  (!%p2477_p13), %s2876_s8, 16, %s2481_s28, [#allocation9]  }
  0x5a   : > { %s2306_s0 = smov [#allocation2]   ;;  %s2128_s22 = scalar_lea.hbm %s2826_s5, 256 }
  0x5b   : > { %s466_s17 = sshll.u32 %s2306_s0, 4  ;;  %p2129_p0 = scmp.ne.s32.totalorder %s2826_s5, %s2128_s22  ;;  %s467_s17 = int_to_ptr.vmem [resolvable:$true] %s466_s17 }
  0x5c   : > { %p2135_p8 = scmp.lt.u32.totalorder %s2128_s22, %s2826_s5 }
  0x5d   : > { %p2131_p2 = pnand %p2129_p0, %p2491_p1 }
  0x5f   : > { %p2132_p4 = pneg %p2131_p2 }
  0x61   : > { %p2137_p10 = pnand %p2135_p8, %p2132_p4 }
  0x63   : > { %2140 = shalt.err (!%p2137_p10)
}
  0x64   : > { %s2141_s28 = scalar_lea.vmem %s467_s17, 256  ;;  %p2149_p6 = scmp.lt.s32.totalorder %s467_s17, %s467_s17 }
  0x65   : > { %p2142_p11 = scmp.ne.s32.totalorder %s467_s17, %s2141_s28  ;;  %p2150_p7 = scmp.lt.s32.totalorder %s2141_s28, %s2141_s28 }
  0x67   : > { %p2144_p3 = pnand %p2142_p11, %p2491_p1  ;;  %p2151_p9 = por %p2150_p7, %p2149_p6 }
  0x69   : > { %p2145_p5 = pneg %p2144_p3 }
  0x6b   : > { %p2152_p12 = pnand %p2151_p9, %p2145_p5 }
  0x6d   : > { %2155 = shalt.err (!%p2152_p12)
}
  0x6e   : > { %s2307_s16 = smov 64   ;;  %s2308_s21 = smov 4  }
  0x6f   : > { %1947 = dma.hbm_to_vmem [thread:$0]  (!%p2477_p13), %s2826_s5, 256, %s467_s17, [#allocation3], %s2307_s16, %s2307_s16, %s2308_s21  }
  0x70   : > { %s2309_s26 = smov [#allocation7]   ;;  %s2310_s22 = smov [#allocation10]  }
  0x71   : > { %s490_s18 = sshll.u32 %s2309_s26, 4  ;;  %s515_s29 = sshll.u32 %s2310_s22, 4  ;;  %s491_s18 = int_to_ptr.vmem [resolvable:$true] %s490_s18  ;;  %s2549_s29 = int_to_ptr.vmem [resolvable:$true] %s515_s29 }
  0x72   : > { %s2156_s28 = scalar_lea.hbm %s2828_s7, 256 }
  0x73   : > { %p2157_p0 = scmp.ne.s32.totalorder %s2828_s7, %s2156_s28  ;;  %p2163_p8 = scmp.lt.u32.totalorder %s2156_s28, %s2828_s7 }
  0x75   : > { %p2159_p2 = pnand %p2157_p0, %p2491_p1 }
  0x77   : > { %p2160_p4 = pneg %p2159_p2 }
  0x79   : > { %p2165_p10 = pnand %p2163_p8, %p2160_p4 }
  0x7b   : > { %2168 = shalt.err (!%p2165_p10)
}
  0x7c   : > { %s2169_s0 = scalar_lea.vmem %s491_s18, 256  ;;  %p2177_p6 = scmp.lt.s32.totalorder %s491_s18, %s491_s18 }
  0x7d   : > { %p2170_p11 = scmp.ne.s32.totalorder %s491_s18, %s2169_s0  ;;  %p2178_p7 = scmp.lt.s32.totalorder %s2169_s0, %s2169_s0 }
  0x7f   : > { %p2172_p3 = pnand %p2170_p11, %p2491_p1  ;;  %p2179_p9 = por %p2178_p7, %p2177_p6 }
  0x81   : > { %p2173_p5 = pneg %p2172_p3 }
  0x83   : > { %p2180_p12 = pnand %p2179_p9, %p2173_p5 }
  0x85   : > { %2183 = shalt.err (!%p2180_p12)
}
  0x86   : > { %1953 = dma.hbm_to_vmem [thread:$0]  (!%p2477_p13), %s2828_s7, 256, %s491_s18, [#allocation6], %s2307_s16, %s2307_s16, %s2308_s21  }
  0x87   : > { %s2184_s20 = scalar_lea.hbm %s2830_s9, 16 }
  0x88   : > { %p2185_p0 = scmp.ne.s32.totalorder %s2830_s9, %s2184_s20  ;;  %p2191_p8 = scmp.lt.u32.totalorder %s2184_s20, %s2830_s9 }
  0x8a   : > { %p2187_p2 = pnand %p2185_p0, %p2491_p1 }
  0x8c   : > { %p2188_p4 = pneg %p2187_p2 }
  0x8e   : > { %p2193_p10 = pnand %p2191_p8, %p2188_p4 }
  0x90   : > { %2196 = shalt.err (!%p2193_p10)
}
  0x91   : > { %s2197_s16 = scalar_lea.vmem %s2549_s29, 16  ;;  %s2204_s21 = scalar_lea.vmem %s2549_s29, 32 }
  0x92   : > { %p2198_p11 = scmp.ne.s32.totalorder %s2549_s29, %s2197_s16  ;;  %p2205_p6 = scmp.lt.s32.totalorder %s2549_s29, %s2549_s29 }
  0x93   : > { %p2206_p7 = scmp.lt.s32.totalorder %s2204_s21, %s2197_s16 }
  0x94   : > { %p2200_p3 = pnand %p2198_p11, %p2491_p1 }
  0x95   : > { %p2207_p9 = por %p2206_p7, %p2205_p6 }
  0x96   : > { %p2201_p5 = pneg %p2200_p3 }
  0x98   : > { %p2208_p12 = pnand %p2207_p9, %p2201_p5 }
  0x9a   : > { %2211 = shalt.err (!%p2208_p12)
}
  0x9b   : > { %1959 = dma.hbm_to_vmem [thread:$0]  (!%p2477_p13), %s2830_s9, 16, %s2549_s29, [#allocation9]  }
  0x9c   : > { %p2877_p0 = scmp.ne.s32.totalorder %s2871_s23, 0 }
  0x9d   : > { %p2878_p1 = scmp.ne.s32.totalorder (!%p2877_p0), %s2872_s24, 0 }
  0x9e   : > { %559 = sbr.rel (%p2877_p0) target bundleno = 2679 (0xa77), region = 88 }
  0xa5   : > { %2265 = dma.done.wait (%p2878_p1), [#allocation3], 256  }
  0xa6   : > { %2267 = vsyncadd (%p2878_p1), [#allocation3], 4294967040 }
  0xa7   : > { %2269 = dma.done.wait (%p2878_p1), [#allocation6], 272  }
  0xa8   : > { %2271 = vsyncadd (%p2878_p1), [#allocation6], 4294967024 }
  0xa9   : > { %2273 = dma.done.wait (%p2878_p1), [#allocation9], 32  }
  0xaa   : > { %2275 = vsyncadd (%p2878_p1), [#allocation9], 4294967264  ;;  %p629_p13 = scmp.lt.s32.totalorder %s2294_s27, 1  ;;  %v2311_v0 = vmov 0.0   ;;  %vm2312_vm0 = vmmov 0   ;;  %s2879_s29 = sld [smem:[#allocation25_spill]] }
  0xab   : > { %1822 = vmatprep.subr.bf16.mxu0 %v2311_v0  ;;  %1830 = vmatprep.subr.bf16.mxu1 %v2311_v0  ;;  %v2039_v2 = vld [vmem:[%s2824_s3] sm:$0xff]   ;;  %s2881_s15 = sld [smem:[#allocation24_spill]]  ;;  %v2041_v4 = vld [vmem:[%s2824_s3 + $0x8] sm:$0xff]   ;;  %vm662_vm1 = vcmask 261120   ;;  %vm875_vm2 = vcmask 64512   ;;  %s2313_s30 = smov 120  }
  0xac   : > { %1826 = vmatprep.mubr.msk.bf16.mxu0 %vm2312_vm0, %v2311_v0  ;;  %1834 = vmatprep.mubr.msk.bf16.mxu1 %vm2312_vm0, %v2311_v0  ;;  %s630_s23 = scalar_select %p629_p13, %s2294_s27, 1  ;;  %v2042_v7 = vld [vmem:[#allocation2] sm:$0xff]   ;;  %v2043_v8 = vld [vmem:[#allocation2 + $0x8] sm:$0xff]   ;;  %v1752_v32 = vld [vmem:[#allocation5] ss:$0 sm:$0xff]  ;;  %vm1111_vm3 = vcmask 1043456  }
  0xad   : > { %1831 = vmatpush3.bf16.msra.mxu1 %v2039_v2  ;;  %v1744_v9 = vld [vmem:[%s2823_s2] ss:$0 sm:$0xff]  ;;  %s2314_s24 = smov 112   ;;  %s2316_s1 = smov 8   ;;  %vm1306_vm4 = vcmask 130048   ;;  %vm1308_vm5 = vcmask 195584  }
  0xae   : > { %s1743_s19 = sshll.u32 %s630_s23, 3  ;;  %1832 = vmatprep.subr.bf16.mxu1 %v2311_v0  ;;  %v1748_v10 = vld [vmem:[%s2825_s4] ss:$0 sm:$0xff]  ;;  %s2317_s26 = smov 16   ;;  %vm1516_vm6 = vcmask 523264  }
  0xaf   : > { %s2318_s22 = smov 24   ;;  %s2882_s6 = sld [smem:[#allocation21_spill]] }
  0xb0   : > { %s2880_s8 = smov %s2879_s29  ;;  %v2038_v1 = vld [vmem:[%s2879_s29] sm:$0xff]   ;;  %s2315_s29 = smov 104  }
  0xb1   : > { %s635_s28 = scalar_lea.vmem %s2881_s15, %s1743_s19  ;;  %1823 = vmatpush3.bf16.msra.mxu0 %v2038_v1  ;;  %v2040_v3 = vld [vmem:[%s2880_s8 + $0x8] sm:$0xff]   ;;  %1833 = vmatpush3.bf16.msra.mxu1 %v2041_v4  ;;  %s626_s15 = sand.u32 1, %s2286_s25  }
  0xb2   : > { %1824 = vmatprep.subr.bf16.mxu0 %v2311_v0  ;;  %v2632_v5 = vld [vmem:[%s635_s28] sm:$0xff]  ;;  %1846 = vmatprep.subr.bf16.mxu1 %v2311_v0  ;;  %s1742_s28 = sshll.u32 %s626_s15, 3  ;;  %s2883_s21 = sld [smem:[#allocation28_spill]] }
  0xb3   : > { %v638_v6 = vpack.c.bf16 %v2632_v5, %v2632_v5  ;;  %s2884_s23 = sld [smem:[#allocation29_spill]]  ;;  %s1783_s19 = sshll.u32 %s2294_s27, 7 }
  0xb4   : > { %s1592_s17 = scalar_lea.sflag [#allocation4], %s626_s15  ;;  %s2319_s27 = smov [#allocation11]  }
  0xb5   : > { %1825 = vmatpush3.bf16.msra.mxu0 %v2040_v3  ;;  %1835 = vmatmul.mubr.msk.bf16.vlgmr.msra.gmra.mrb[0].mxu1 %vm662_vm1, %v638_v6  ;;  %p2887_p4 = scmp.ne.s32.totalorder %s2882_s6, 0 }
  0xb6   : > { %1838 = vmatprep.subr.bf16.mxu0 %v2311_v0  ;;  %1848 = vmatprep.mubr.msk.bf16.mxu1 %vm2312_vm0, %v2311_v0 }
  0xb8   : > { %1827 = vmatmul.mubr.msk.bf16.vlgmr.msra.gmra.mrb[0].mxu0 %vm662_vm1, %v638_v6 }
  0xb9   : > { %1842 = vmatprep.mubr.msk.bf16.mxu0 %vm2312_vm0, %v2311_v0  ;;  %1839 = vmatpush3.bf16.msra.mxu0 %v2042_v7 }
  0xba   : > { %1840 = vmatprep.subr.bf16.mxu0 %v2311_v0 }
  0xbd   : > { %1841 = vmatpush3.bf16.msra.mxu0 %v2043_v8 }
  0xbe   : > { %1852 = vmatprep.subr.bf16.mxu0 %v2311_v0 }
  0xc0   : > { %1843 = vmatmul.mubr.msk.bf16.vlgmr.msra.gmra.mrb[4].mxu0 %vm662_vm1, %v638_v6 }
  0xc1   : > { %1854 = vmatprep.mubr.msk.bf16.mxu0 %vm2312_vm0, %v2311_v0 }
 0x188   : > { %v763_v13 = vpop.f32.mrb[0].mxu1 }
 0x189   : > { %v764_v15 = vadd.f32 %v1748_v10, %v763_v13  ;;  %v1836_v16 = vpop.f32.mrb[1].mxu1 }
 0x18a   : > { %v766_v19 = vpop.f32.mrb[2].mxu1 }
 0x18b   : > { %v700_v11 = vpop.f32.mrb[0].mxu0  ;;  %848 = vrot.lane.b32.xlu0 %v764_v15, %s2313_s30  ;;  %v1837_v21 = vpop.f32.mrb[3].mxu1  ;;  %v857_v22 = vpack.c.bf16 %v764_v15, %v764_v15 }
 0x18c   : > { %v701_v12 = vadd.f32 %v1744_v9, %v700_v11  ;;  %v1828_v14 = vpop.f32.mrb[1].mxu0 }
 0x18d   : > { %v703_v17 = vpop.f32.mrb[2].mxu0  ;;  %v880_v23 = vsel %vm875_vm2, %v857_v22, 0 }
 0x18e   : > { %v832_v18 = vmul.f32 0.35355338, %v701_v12  ;;  %v1829_v20 = vpop.f32.mrb[3].mxu0  ;;  %1847 = vmatpush3.bf16.xpose.msra.mxu1 %v880_v23 }
 0x18f   : > { %851 = vrot.lane.b32.xlu0 %v764_v15, %s2314_s24  ;;  %1858 = vmatprep.subr.bf16.mxu1 %v2311_v0 }
 0x190   : > { %834 = vrot.lane.b32.xlu1 %v832_v18, %s2313_s30  ;;  %v843_v24 = vpack.c.bf16 %v832_v18, %v832_v18 }
 0x193   : > { %837 = vrot.lane.b32.xlu0 %v832_v18, %s2314_s24  ;;  %v826_v25 = vpop.f32.mrb[4].mxu0 }
 0x194   : > { %854 = vrot.lane.b32.xlu1 %v764_v15, %s2315_s29  ;;  %v1844_v26 = vpop.f32.mrb[5].mxu0  ;;  %v2668_v37 = vadd.f32 %v1752_v32, %v826_v25 }
 0x195   : > { %1849 = vmatmul.mubr.msk.bf16.vlgmr.msra.gmra.mrb[4].mxu1 %vm875_vm2, %v843_v24  ;;  %v829_v27 = vpop.f32.mrb[6].mxu0 }
 0x196   : > { %1860 = vmatprep.mubr.msk.bf16.mxu1 %vm2312_vm0, %v2311_v0  ;;  %v1845_v28 = vpop.f32.mrb[7].mxu0  ;;  %v871_v41 = vpack.c.bf16 %v2668_v37, %v2668_v37 }
 0x198   : > { %840 = vrot.lane.b32.xlu1 %v832_v18, %s2315_s29  ;;  %v1113_v45 = vsel %vm1111_vm3, %v871_v41, 0 }
 0x1fd   : > { %v849_v29 = vpop.permute.xlu0 %848 }
 0x1fe   : > { %v858_v30 = vpack.c.bf16 %v849_v29, %v849_v29 }
 0x200   : > { %v926_v33 = vsel %vm875_vm2, %v858_v30, 0 }
 0x201   : > { %v852_v34 = vpop.permute.xlu0 %851  ;;  %1853 = vmatpush3.bf16.xpose.msra.mxu0 %v926_v33 }
 0x202   : > { %v835_v31 = vpop.permute.xlu1 %834  ;;  %v859_v35 = vpack.c.bf16 %v852_v34, %v852_v34  ;;  %1864 = vmatprep.subr.bf16.mxu0 %v2311_v0 }
 0x203   : > { %v844_v40 = vpack.c.bf16 %v835_v31, %v835_v31 }
 0x204   : > { %v972_v38 = vsel %vm875_vm2, %v859_v35, 0 }
 0x205   : > { %1859 = vmatpush3.bf16.xpose.msra.mxu1 %v972_v38  ;;  %v838_v42 = vpop.permute.xlu0 %837 }
 0x206   : > { %v855_v36 = vpop.permute.xlu1 %854  ;;  %1870 = vmatprep.subr.bf16.mxu1 %v2311_v0  ;;  %v845_v44 = vpack.c.bf16 %v838_v42, %v838_v42 }
 0x207   : > { %v860_v39 = vpack.c.bf16 %v855_v36, %v855_v36 }
 0x208   : > { %1855 = vmatmul.mubr.msk.bf16.vlgmr.msra.gmra.mrb[8].mxu0 %vm875_vm2, %v844_v40 }
 0x209   : > { %v1018_v43 = vsel %vm875_vm2, %v860_v39, 0  ;;  %1866 = vmatprep.mubr.msk.bf16.mxu0 %vm2312_vm0, %v2311_v0 }
 0x20a   : > { %1865 = vmatpush3.bf16.xpose.msra.mxu0 %v1018_v43  ;;  %v841_v46 = vpop.permute.xlu1 %840 }
 0x20b   : > { %1876 = vmatprep.subr.bf16.mxu0 %v2311_v0  ;;  %v846_v47 = vpack.c.bf16 %v841_v46, %v841_v46 }
 0x20c   : > { %1861 = vmatmul.mubr.msk.bf16.vlgmr.msra.gmra.mrb[8].mxu1 %vm875_vm2, %v845_v44 }
 0x20d   : > { %1871 = vmatpush3.bf16.msra.mxu1 %v1113_v45  ;;  %1872 = vmatprep.mubr.msk.bf16.mxu1 %vm2312_vm0, %v2311_v0 }
 0x20e   : > { %1882 = vmatprep.subr.bf16.mxu1 %v2311_v0 }
 0x211   : > { %1867 = vmatmul.mubr.msk.bf16.vlgmr.msra.gmra.mrb[12].mxu0 %vm875_vm2, %v846_v47 }
 0x212   : > { %1878 = vmatprep.mubr.msk.bf16.mxu0 %vm2312_vm0, %v2311_v0 }
 0x268   : > { %v916_v48 = vpop.f32.mrb[4].mxu1 }
 0x269   : > { %v1850_v49 = vpop.f32.mrb[5].mxu1  ;;  %v1060_v50 = vsel %vm875_vm2, %v916_v48, -inf }
 0x26a   : > { %1061 = vmax.xlane.f32.xlu0 %v1060_v50  ;;  %v919_v51 = vpop.f32.mrb[6].mxu1 }
 0x26b   : > { %v1851_v52 = vpop.f32.mrb[7].mxu1 }
 0x2db   : > { %v962_v53 = vpop.f32.mrb[8].mxu0 }
 0x2dc   : > { %v1856_v54 = vpop.f32.mrb[9].mxu0  ;;  %v1063_v55 = vsel %vm875_vm2, %v962_v53, -inf }
 0x2dd   : > { %1064 = vmax.xlane.f32.xlu1 %v1063_v55  ;;  %v965_v56 = vpop.f32.mrb[10].mxu0  ;;  %v2044_v55 = vld [vmem:[#allocation7] sm:$0xff]  }
 0x2de   : > { %v1857_v57 = vpop.f32.mrb[11].mxu0  ;;  %v2045_v56 = vld [vmem:[#allocation7 + $0x8] sm:$0xff]  }
 0x2df   : > { %v1008_v58 = vpop.f32.mrb[8].mxu1 }
 0x2e0   : > { %v1862_v59 = vpop.f32.mrb[9].mxu1  ;;  %v1066_v60 = vsel %vm875_vm2, %v1008_v58, -inf }
 0x2e1   : > { %1067 = vmax.xlane.f32.xlu0 %v1066_v60  ;;  %v1011_v61 = vpop.f32.mrb[10].mxu1 }
 0x2e2   : > { %v1863_v62 = vpop.f32.mrb[11].mxu1 }
 0x2e4   : > { %v1054_v63 = vpop.f32.mrb[12].mxu0 }
 0x2e5   : > { %v1868_v1 = vpop.f32.mrb[13].mxu0  ;;  %v1069_v2 = vsel %vm875_vm2, %v1054_v63, -inf }
 0x2e6   : > { %1070 = vmax.xlane.f32.xlu0 %v1069_v2  ;;  %v1057_v3 = vpop.f32.mrb[14].mxu0 }
 0x2e7   : > { %v1869_v4 = vpop.f32.mrb[15].mxu0 }
 0x2ee   : > { %862 = vrot.lane.b32.xlu1 %v2668_v37, %s2313_s30  ;;  %s628_s30 = scalar_lea.vmem [#allocation11], %s1742_s28  ;;  %s2216_s28 = sshll.u32 %s2319_s27, 4  ;;  %s2217_s28 = int_to_ptr.vmem [resolvable:$false] %s2216_s28 }
 0x2f7   : > { %v1062_v6 = vpop.xlane.xlu0 %1061 }
 0x2f8   : > { %v1072_v7 = vsub.f32 %v916_v48, %v1062_v6 }
 0x2fa   : > { %v1076_v8 = vmul.f32 1.442695, %v1072_v7 }
 0x2fc   : > { %2052 = vpow2.f32 %v1076_v8 }
 0x306   : > { %v2053_v9 = vpop.eup %2052 }
 0x307   : > { %v1084_v10 = vsel %vm875_vm2, %v2053_v9, 0.0 }
 0x312   : > { %1085 = vadd.xlane.f32.xlu1 %v1084_v10 }
 0x36a   : > { %v1065_v11 = vpop.xlane.xlu1 %1064 }
 0x36b   : > { %v1073_v12 = vsub.f32 %v962_v53, %v1065_v11 }
 0x36d   : > { %v1078_v13 = vmul.f32 1.442695, %v1073_v12 }
 0x36e   : > { %v1068_v14 = vpop.xlane.xlu0 %1067  ;;  %v863_v15 = vpop.permute.xlu1 %862 }
 0x36f   : > { %2054 = vpow2.f32 %v1078_v13  ;;  %v1074_v16 = vsub.f32 %v1008_v58, %v1068_v14  ;;  %v872_v17 = vpack.c.bf16 %v863_v15, %v863_v15  ;;  %v1764_v14 = vld [vmem:[#allocation8] ss:$0 sm:$0xff] }
 0x371   : > { %v1080_v18 = vmul.f32 1.442695, %v1074_v16  ;;  %v1159_v19 = vsel %vm1111_vm3, %v872_v17, 0 }
 0x372   : > { %1877 = vmatpush3.bf16.msra.mxu0 %v1159_v19 }
 0x373   : > { %v1071_v20 = vpop.xlane.xlu0 %1070  ;;  %2056 = vpow2.f32 %v1080_v18  ;;  %1888 = vmatprep.subr.bf16.mxu0 %v2311_v0 }
 0x374   : > { %v1075_v21 = vsub.f32 %v1054_v63, %v1071_v20 }
 0x376   : > { %v1082_v22 = vmul.f32 1.442695, %v1075_v21 }
 0x378   : > { %2058 = vpow2.f32 %v1082_v22 }
 0x379   : > { %v2055_v23 = vpop.eup %2054 }
 0x37a   : > { %v1087_v24 = vsel %vm875_vm2, %v2055_v23, 0.0 }
 0x37b   : > { %1088 = vadd.xlane.f32.xlu0 %v1087_v24 }
 0x37d   : > { %v2057_v25 = vpop.eup %2056 }
 0x37e   : > { %v1090_v26 = vsel %vm875_vm2, %v2057_v25, 0.0 }
 0x37f   : > { %1091 = vadd.xlane.f32.xlu1 %v1090_v26 }
 0x382   : > { %v2059_v27 = vpop.eup %2058 }
 0x383   : > { %v1093_v28 = vsel %vm875_vm2, %v2059_v27, 0.0 }
 0x384   : > { %1094 = vadd.xlane.f32.xlu0 %v1093_v28  ;;  %v2047_v28 = vld [vmem:[%s2832_s11 + $0x8] sm:$0xff]  }
 0x390   : > { %868 = vrot.lane.b32.xlu1 %v2668_v37, %s2315_s29 }
 0x39a   : > { %865 = vrot.lane.b32.xlu0 %v2668_v37, %s2314_s24  ;;  %s1606_s24 = sshll.u32 %s628_s30, 4  ;;  %s2775_s24 = int_to_ptr.vmem [resolvable:$true] %s1606_s24 }
 0x39b   : > { %s2212_s16 = scalar_lea.vmem %s2775_s24, 128  ;;  %p2219_p11 = scmp.lt.s32.totalorder %s2775_s24, %s2217_s28 }
 0x39c   : > { %p2213_p2 = scmp.ne.s32.totalorder %s2775_s24, %s2212_s16 }
 0x39e   : > { %p2214_p8 = pnand %p2213_p2, %p2887_p4 }
 0x39f   : > { %v1086_v29 = vpop.xlane.xlu1 %1085 }
 0x3a0   : > { %2060 = vrcp.f32 %v1086_v29  ;;  %v2049_v29 = vld [vmem:[%s2834_s13 + $0x8] sm:$0xff]   ;;  %p2215_p10 = pneg %p2214_p8 }
 0x3aa   : > { %v2061_v30 = vpop.eup %2060 }
 0x3ab   : > { %v1100_v31 = vmul.f32 %v2061_v30, %v2053_v9 }
 0x3ad   : > { %v1104_v32 = vpack.c.bf16 %v1100_v31, %v1100_v31 }
 0x3af   : > { %1873 = vmatmul.mubr.msk.bf16.vlgmr.msra.gmra.mrb[12].mxu1 %vm875_vm2, %v1104_v32 }
 0x3b0   : > { %1884 = vmatprep.mubr.msk.bf16.mxu1 %vm2312_vm0, %v2311_v0 }
 0x408   : > { %v1089_v33 = vpop.xlane.xlu0 %1088 }
 0x409   : > { %2062 = vrcp.f32 %v1089_v33 }
 0x40c   : > { %v1092_v34 = vpop.xlane.xlu1 %1091 }
 0x40d   : > { %2064 = vrcp.f32 %v1092_v34  ;;  %v1768_v34 = vld [vmem:[#allocation10] ss:$0 sm:$0xff] }
 0x410   : > { %v869_v36 = vpop.permute.xlu1 %868 }
 0x411   : > { %v1095_v35 = vpop.xlane.xlu0 %1094  ;;  %v874_v37 = vpack.c.bf16 %v869_v36, %v869_v36  ;;  %v1769_v36 = vld [vmem:[%s2831_s10] ss:$0 sm:$0xff] }
 0x412   : > { %2066 = vrcp.f32 %v1095_v35 }
 0x413   : > { %v2063_v38 = vpop.eup %2062  ;;  %v1251_v46 = vsel %vm1111_vm3, %v874_v37, 0 }
 0x414   : > { %v1101_v39 = vmul.f32 %v2063_v38, %v2055_v23 }
 0x415   : > { %v866_v40 = vpop.permute.xlu0 %865 }
 0x416   : > { %v873_v41 = vpack.c.bf16 %v866_v40, %v866_v40  ;;  %v1105_v42 = vpack.c.bf16 %v1101_v39, %v1101_v39  ;;  %v2050_v40 = vld [vmem:[%s2834_s13 + $0x10] sm:$0xff]  }
 0x417   : > { %v2065_v43 = vpop.eup %2064 }
 0x418   : > { %v1205_v44 = vsel %vm1111_vm3, %v873_v41, 0  ;;  %v1102_v45 = vmul.f32 %v2065_v43, %v2057_v25  ;;  %1879 = vmatmul.mubr.msk.bf16.vlgmr.msra.gmra.mrb[16].mxu0 %vm875_vm2, %v1105_v42  ;;  %v2051_v41 = vld [vmem:[%s2834_s13 + $0x18] sm:$0xff]   ;;  %v1770_v42 = vld [vmem:[%s2833_s12] ss:$0 sm:$0xff] }
 0x419   : > { %1883 = vmatpush3.bf16.msra.mxu1 %v1205_v44  ;;  %1889 = vmatpush3.bf16.msra.mxu0 %v1251_v46 }
 0x41a   : > { %1890 = vmatprep.mubr.msk.bf16.mxu0 %vm2312_vm0, %v2311_v0  ;;  %v1106_v47 = vpack.c.bf16 %v1102_v45, %v1102_v45  ;;  %1894 = vmatprep.subr.bf16.mxu1 %v2311_v0 }
 0x41b   : > { %1902 = vmatprep.subr.bf16.mxu0 %v2311_v0 }
 0x41c   : > { %v2067_v48 = vpop.eup %2066  ;;  %1885 = vmatmul.mubr.msk.bf16.vlgmr.msra.gmra.mrb[16].mxu1 %vm875_vm2, %v1106_v47 }
 0x41d   : > { %v1103_v49 = vmul.f32 %v2067_v48, %v2059_v27  ;;  %1898 = vmatprep.mubr.msk.bf16.mxu1 %vm2312_vm0, %v2311_v0  ;;  %1895 = vmatpush3.bf16.msra.mxu1 %v2044_v55  ;;  %v2046_v27 = vld [vmem:[%s2832_s11] sm:$0xff]  }
 0x41e   : > { %1896 = vmatprep.subr.bf16.mxu1 %v2311_v0 }
 0x41f   : > { %v1107_v50 = vpack.c.bf16 %v1103_v49, %v1103_v49 }
 0x421   : > { %1891 = vmatmul.mubr.msk.bf16.vlgmr.msra.gmra.mrb[20].mxu0 %vm875_vm2, %v1107_v50  ;;  %1897 = vmatpush3.bf16.msra.mxu1 %v2045_v56 }
 0x422   : > { %1906 = vmatprep.mubr.msk.bf16.mxu0 %vm2312_vm0, %v2311_v0  ;;  %1910 = vmatprep.subr.bf16.mxu1 %v2311_v0 }
 0x423   : > { %1903 = vmatpush3.bf16.msra.mxu0 %v2046_v27 }
 0x424   : > { %1904 = vmatprep.subr.bf16.mxu0 %v2311_v0 }
 0x427   : > { %1905 = vmatpush3.bf16.msra.mxu0 %v2047_v28 }
 0x482   : > { %v1149_v51 = vpop.f32.mrb[12].mxu1 }
 0x483   : > { %v1874_v52 = vpop.f32.mrb[13].mxu1 }
 0x484   : > { %v1152_v53 = vpop.f32.mrb[14].mxu1 }
 0x485   : > { %v1875_v54 = vpop.f32.mrb[15].mxu1 }
 0x4eb   : > { %v1195_v57 = vpop.f32.mrb[16].mxu0 }
 0x4ec   : > { %1294 = vrot.lane.b32.xlu1 %v1195_v57, %s2316_s1  ;;  %v1880_v58 = vpop.f32.mrb[17].mxu0 }
 0x4ed   : > { %v1198_v59 = vpop.f32.mrb[18].mxu0 }
 0x4ee   : > { %v1881_v60 = vpop.f32.mrb[19].mxu0 }
 0x4ef   : > { %v1241_v61 = vpop.f32.mrb[16].mxu1 }
 0x4f0   : > { %1298 = vrot.lane.b32.xlu0 %v1241_v61, %s2317_s26  ;;  %v1886_v62 = vpop.f32.mrb[17].mxu1  ;;  %s2885_s26 = sld [smem:[#allocation30_spill]] }
 0x4f1   : > { %v1244_v63 = vpop.f32.mrb[18].mxu1 }
 0x4f2   : > { %v1887_v1 = vpop.f32.mrb[19].mxu1 }
 0x4f4   : > { %v1287_v2 = vpop.f32.mrb[20].mxu0 }
 0x4f5   : > { %1302 = vrot.lane.b32.xlu1 %v1287_v2, %s2318_s22  ;;  %v1892_v3 = vpop.f32.mrb[21].mxu0 }
 0x4f6   : > { %v1290_v4 = vpop.f32.mrb[22].mxu0  ;;  %v1780_v3 = vld [vmem:[%s2883_s21] ss:$0 sm:$0xff]  ;;  %s2886_s22 = smov %s2885_s26  ;;  %s2773_s20 = scalar_lea.hbm %s2885_s26, %s1783_s19 }
 0x4f7   : > { %v1893_v6 = vpop.f32.mrb[23].mxu0  ;;  %s2218_s21 = scalar_lea.vmem %s2217_s28, 256 }
 0x4f8   : > { %v1781_v6 = vld [vmem:[%s2884_s23] ss:$0 sm:$0xff]  ;;  %p2220_p3 = scmp.lt.s32.totalorder %s2218_s21, %s2212_s16 }
 0x4fa   : > { %p2221_p5 = por %p2220_p3, %p2219_p11 }
 0x4fc   : > { %p2222_p6 = pnand %p2221_p5, %p2215_p10 }
 0x55e   : > { %v1295_v7 = vpop.permute.xlu1 %1294 }
 0x55f   : > { %v1305_v9 = vsel %vm875_vm2, %v1149_v51, %v1295_v7 }
 0x562   : > { %v1299_v8 = vpop.permute.xlu0 %1298 }
 0x563   : > { %v1307_v10 = vsel %vm1306_vm4, %v1305_v9, %v1299_v8 }
 0x567   : > { %v1303_v11 = vpop.permute.xlu1 %1302 }
 0x568   : > { %v1309_v12 = vsel %vm1308_vm5, %v1307_v10, %v1303_v11 }
 0x569   : > { %v1310_v13 = vpack.c.bf16 %v1309_v12, %v1309_v12 }
 0x56b   : > { %1899 = vmatmul.mubr.msk.bf16.vlgmr.msra.gmra.mrb[20].mxu1 %vm662_vm1, %v1310_v13 }
 0x56c   : > { %1918 = vmatprep.mubr.msk.bf16.mxu1 %vm2312_vm0, %v2311_v0 }
 0x63e   : > { %v1371_v15 = vpop.f32.mrb[20].mxu1 }
 0x63f   : > { %v1372_v16 = vadd.f32 %v1764_v14, %v1371_v15  ;;  %v1900_v17 = vpop.f32.mrb[21].mxu1 }
 0x640   : > { %v1374_v18 = vpop.f32.mrb[22].mxu1 }
 0x641   : > { %v1901_v19 = vpop.f32.mrb[23].mxu1  ;;  %v1377_v20 = vadd.f32 %v1372_v16, %v2632_v5  ;;  %v2048_v5 = vld [vmem:[%s2834_s13] sm:$0xff]  }
 0x642   : > { %1911 = vmatpush3.bf16.msra.mxu1 %v2048_v5 }
 0x643   : > { %v1380_v21 = vsel %vm662_vm1, %v1377_v20, 0.0  ;;  %1912 = vmatprep.subr.bf16.mxu1 %v2311_v0 }
 0x644   : > { %1381 = vadd.xlane.f32.xlu0 %v1380_v21 }
 0x646   : > { %1913 = vmatpush3.bf16.msra.mxu1 %v2049_v29 }
 0x647   : > { %1914 = vmatprep.subr.bf16.mxu1 %v2311_v0 }
 0x64a   : > { %1915 = vmatpush3.bf16.msra.mxu1 %v2050_v40 }
 0x64b   : > { %1916 = vmatprep.subr.bf16.mxu1 %v2311_v0  ;;  %v1774_v0 = vld [vmem:[%s2835_s14] ss:$0 sm:$0xff] }
 0x64e   : > { %1917 = vmatpush3.bf16.msra.mxu1 %v2051_v41 }
 0x6d1   : > { %v1382_v22 = vpop.xlane.xlu0 %1381 }
 0x6d2   : > { %v1384_v23 = vmul.f32 0.03125, %v1382_v22 }
 0x6d4   : > { %v1385_v24 = vsub.f32 %v1377_v20, %v1384_v23 }
 0x6d6   : > { %v1386_v25 = vmul.f32 %v1385_v24, %v1385_v24 }
 0x6d8   : > { %v1387_v26 = vsel %vm662_vm1, %v1386_v25, 0.0 }
 0x6d9   : > { %1388 = vadd.xlane.f32.xlu1 %v1387_v26 }
 0x766   : > { %v1389_v30 = vpop.xlane.xlu1 %1388 }
 0x767   : > { %v1390_v31 = vmul.f32 0.03125, %v1389_v30 }
 0x769   : > { %v1391_v32 = vadd.f32 1e-12, %v1390_v31 }
 0x76b   : > { %2068 = vrsqrt.f32 %v1391_v32 }
 0x775   : > { %v2069_v33 = vpop.eup %2068 }
 0x776   : > { %v1393_v35 = vmul.f32 %v2069_v33, %v1385_v24 }
 0x778   : > { %v1400_v38 = vmul.f32 %v1768_v34, %v1393_v35 }
 0x77a   : > { %v1407_v39 = vadd.f32 %v1769_v36, %v1400_v38 }
 0x77c   : > { %v1408_v37 = vpack.c.bf16 %v1407_v39, %v1407_v39 }
 0x77e   : > { %1907 = vmatmul.mubr.msk.bf16.vlgmr.msra.gmra.mrb[24].mxu0 %vm662_vm1, %v1408_v37 }
 0x851   : > { %v1469_v43 = vpop.f32.mrb[24].mxu0 }
 0x852   : > { %v1470_v44 = vadd.f32 %v1770_v42, %v1469_v43  ;;  %v1908_v45 = vpop.f32.mrb[25].mxu0 }
 0x853   : > { %v1472_v46 = vpop.f32.mrb[26].mxu0 }
 0x854   : > { %v1475_v47 = vmax.f32 %v1470_v44, 0.0  ;;  %v1909_v48 = vpop.f32.mrb[27].mxu0 }
 0x856   : > { %v1476_v49 = vpack.c.bf16 %v1475_v47, %v1475_v47 }
 0x858   : > { %1919 = vmatmul.mubr.msk.bf16.vlgmr.msra.gmra.mrb[24].mxu1 %vm1516_vm6, %v1476_v49 }
 0x92b   : > { %v1554_v50 = vpop.f32.mrb[24].mxu1 }
 0x92c   : > { %v1555_v51 = vadd.f32 %v1774_v0, %v1554_v50  ;;  %v1920_v52 = vpop.f32.mrb[25].mxu1 }
 0x92d   : > { %v1557_v53 = vpop.f32.mrb[26].mxu1 }
 0x92e   : > { %v1921_v54 = vpop.f32.mrb[27].mxu1  ;;  %v1560_v55 = vadd.f32 %v1555_v51, %v1407_v39 }
 0x930   : > { %v1563_v56 = vsel %vm662_vm1, %v1560_v55, 0.0 }
 0x931   : > { %1564 = vadd.xlane.f32.xlu0 %v1563_v56 }
 0x9be   : > { %v1565_v57 = vpop.xlane.xlu0 %1564 }
 0x9bf   : > { %v1566_v58 = vmul.f32 0.03125, %v1565_v57 }
 0x9c1   : > { %v1567_v59 = vsub.f32 %v1560_v55, %v1566_v58 }
 0x9c3   : > { %v1568_v60 = vmul.f32 %v1567_v59, %v1567_v59 }
 0x9c5   : > { %v1569_v61 = vsel %vm662_vm1, %v1568_v60, 0.0 }
 0x9c6   : > { %1570 = vadd.xlane.f32.xlu0 %v1569_v61 }
 0xa53   : > { %v1571_v62 = vpop.xlane.xlu0 %1570 }
 0xa54   : > { %v1572_v63 = vmul.f32 0.03125, %v1571_v62 }
 0xa56   : > { %v1573_v1 = vadd.f32 1e-12, %v1572_v63 }
 0xa58   : > { %2070 = vrsqrt.f32 %v1573_v1 }
 0xa62   : > { %v2071_v2 = vpop.eup %2070 }
 0xa63   : > { %v1575_v4 = vmul.f32 %v2071_v2, %v1567_v59 }
 0xa65   : > { %v1582_v7 = vmul.f32 %v1780_v3, %v1575_v4 }
 0xa67   : > { %v1589_v8 = vadd.f32 %v1781_v6, %v1582_v7 }
 0xa69   : > { %1590 = vst.msk [vmem:[%s628_s30] sm:$0xff] %vm662_vm1, %v1589_v8 }
 0xa6a   : > { %2225 = shalt.err (!%p2222_p6)
}
 0xa6b   : > { %s2226_s15 = scalar_lea.hbm %s2773_s20, 128  ;;  %s2230_s23 = scalar_lea.hbm %s2886_s22, 256 }
 0xa6c   : > { %p2227_p7 = scmp.ne.s32.totalorder %s2773_s20, %s2226_s15  ;;  %p2231_p0 = scmp.lt.u32.totalorder %s2773_s20, %s2886_s22 }
 0xa6d   : > { %p2232_p1 = scmp.lt.u32.totalorder %s2230_s23, %s2226_s15  ;;  %p2234_p2 = scmp.lt.u32.totalorder %s2226_s15, %s2773_s20 }
 0xa6e   : > { %p2228_p9 = pnand %p2227_p7, %p2887_p4 }
 0xa6f   : > { %p2233_p13 = por %p2232_p1, %p2231_p0 }
 0xa70   : > { %p2229_p12 = pneg %p2228_p9 }
 0xa71   : > { %p2235_p8 = por %p2234_p2, %p2233_p13 }
 0xa73   : > { %p2236_p10 = pnand %p2235_p8, %p2229_p12 }
 0xa75   : > { %2239 = shalt.err (!%p2236_p10)
}
 0xa76   : > { %1942 = dma.vmem_to_hbm [thread:$0]  (%p2887_p4), %s2775_s24, 128, %s2773_s20, %s1592_s17  }
 0xa77 PF: > { %s2888_s29 = sld [smem:[#allocation19_spill]]  ;;  %s2889_s1 = sld [smem:[#allocation16_spill]] }
 0xa78   : > { %s2890_s26 = sld [smem:[#allocation22_spill]] }
 0xa7d   : > { %p1974_p11 = scmp.ge.s32.totalorder %s2888_s29, 2  ;;  %s1618_s16 = sand.u32 1, %s2889_s1  }
 0xa7e   : > { %p2891_p3 = scmp.ne.s32.totalorder %s2890_s26, 0  ;;  %s1619_s27 = scalar_lea.sflag [#allocation4], %s1618_s16 }
 0xa80   : > { %p1961_p5 = pnand %p1974_p11, %p2891_p3 }
 0xa82   : > { %2277 = dma.done.wait (!%p1961_p5), %s1619_s27, 128  }
 0xa83   : > { %2279 = vsyncadd (!%p1961_p5), %s1619_s27, 4294967168  ;;  %s33_s29 = sadd.s32 1, %s2888_s29   ;;  %s2892_s28 = sld [smem:[#allocation17_spill]] }
 0xa84   : > { %p30_p6 = scmp.ge.s32.totalorder %s33_s29, 4   ;;  %s2893_s26 = sld [smem:[#allocation23_spill]] }
 0xa85   : > { %s2894_s27 = sld [smem:[#allocation18_spill]]  ;;  %s2895_s6 = sld [smem:[#allocation20_spill]] }
 0xa86   : > { %s2896_s24 = smov %s2286_s25  ;;  %32 = sbr.rel (!%p30_p6) target bundleno = 15 (0xf), region = 144 }
 0xa89   : > { %s2897_s25 = smov %s2892_s28 }
 0xa8b   : > { %s2898_s28 = smov %s2895_s6 }
 0xa8d   :  { %1624 = vsyncpa [#allocation3], 1 }
 0xa8e   :  { %1626 = vsyncpa [#allocation3 + $0x1], 1 }
 0xa8f   :  { %1627 = vsyncpa [#allocation6], 1 }
 0xa90   :  { %1628 = vsyncpa [#allocation9], 1 }
 0xa91   :  { %1629 = vsyncpa [#allocation4], 1 }
 0xa92   :  { %1631 = vsyncpa [#allocation4 + $0x1], 1 }

</bundles_post_ra>
